<compile_context>
chip_gen: v7x
topology: tpu7x:2x2x1
jax: 0.10.0
libtpu: 0.0.40
codegen_flags: <defaults>
</compile_context>

<pallas_src>
import functools

import jax
import jax.numpy as jnp
from jax.experimental import pallas as pl
from jax.experimental.pallas import tpu as pltpu

_LANE = 128     # lane width (feature alignment inside the packed weight stack)
_SUBLANE = 8    # f32 sublane count (batch / second-to-last-dim alignment)


def _round_up(x, m):
    return (x + m - 1) // m * m


def _cdiv(a, b):
    return -(-a // b)


def _mlp_kernel(num_layers, in_p, out_size, x_ref, w_ref, b_ref, o_ref):
    """x_ref: (tb, in_p); w_ref: (L, F, F); b_ref: (L, 1, F); o_ref: (tb, out_size)."""
    h = x_ref[...]
    for i in range(num_layers):
        # Layer 0 contracts only over the real (sublane-rounded) input columns.
        w = w_ref[i][:in_p, :] if i == 0 else w_ref[i]
        h = jnp.dot(h.astype(w.dtype), w, preferred_element_type=jnp.float32)
        h = h + b_ref[i]                      # f32 epilogue
        if i < num_layers - 1:
            h = jnp.maximum(h, 0.0)           # ReLU on hidden layers only
    o_ref[...] = h[:, :out_size].astype(o_ref.dtype)


def prepare_params(weights, biases, *, param_dtype=jnp.float32):
    """Pack + pad parameters ONCE (call outside the hot path).

    weights: list of [in_i, out_i] arrays (transpose of nn.Linear's [out, in])
    biases:  list of [out_i] arrays
    returns: (w_stack [L, F, F] param_dtype, b_stack [L, 1, F] float32)
    Zero padding is exact for Linear+ReLU stacks (padded lanes carry bias 0,
    padded weight rows are 0, so padded lanes never contribute).
    """
    num_layers = len(weights)
    feat = _round_up(max(max(w.shape) for w in weights), _LANE)
    w_stack = jnp.zeros((num_layers, feat, feat), param_dtype)
    b_stack = jnp.zeros((num_layers, 1, feat), jnp.float32)
    for i, (w, b) in enumerate(zip(weights, biases)):
        din, dout = w.shape
        w_stack = w_stack.at[i, :din, :dout].set(w.astype(param_dtype))
        b_stack = b_stack.at[i, 0, :dout].set(jnp.reshape(b, (-1,)).astype(jnp.float32))
    return w_stack, b_stack


def high_level_policy_forward(x, w_stack, b_stack, out_size, *, max_batch_tile=512):
    """Fused MLP forward. x: [B, input_size] f32 -> [B, out_size] f32."""
    B, in_size = x.shape
    num_layers, feat, _ = w_stack.shape

    # Pad input features only up to the sublane (<= 7 zero columns; matching weight
    # rows in w_stack are zero, so this is exact). No 128-lane padding of x.
    in_p = _round_up(in_size, _SUBLANE)
    if in_p != in_size:
        x = jnp.pad(x, ((0, 0), (0, in_p - in_size)))

    # Adaptive batch tiling: single tile when it fits, otherwise near-equal tiles
    # with an even tile count (balanced over v7x's two TensorCores).
    n_tiles = _cdiv(B, max_batch_tile)
    if n_tiles > 1 and n_tiles % 2 == 1:
        n_tiles += 1
    tb = _round_up(_cdiv(B, n_tiles), _SUBLANE)
    b_pad = n_tiles * tb
    if b_pad != B:
        x = jnp.pad(x, ((0, b_pad - B), (0, 0)))

    flops = 2 * b_pad * (in_p * feat + (num_layers - 1) * feat * feat)
    bytes_accessed = (
        x.size * x.dtype.itemsize
        + w_stack.size * w_stack.dtype.itemsize
        + b_stack.size * b_stack.dtype.itemsize
        + b_pad * out_size * 4
    )

    kernel = functools.partial(_mlp_kernel, num_layers, in_p, out_size)
    out = pl.pallas_call(
        kernel,
        out_shape=jax.ShapeDtypeStruct((b_pad, out_size), jnp.float32),
        grid=(n_tiles,),
        in_specs=[
            # Activations: tiled along the batch axis (pipelined against MXU work).
            pl.BlockSpec((tb, in_p), lambda i: (i, 0)),
            # Packed weights / biases: constant index_map -> DMA'd once, VMEM-resident.
            pl.BlockSpec((num_layers, feat, feat), lambda i: (0, 0, 0)),
            pl.BlockSpec((num_layers, 1, feat), lambda i: (0, 0, 0)),
        ],
        out_specs=pl.BlockSpec((tb, out_size), lambda i: (i, 0)),
        compiler_params=pltpu.CompilerParams(
            dimension_semantics=("parallel",),
        ),
        cost_estimate=pl.CostEstimate(
            flops=flops, transcendentals=0, bytes_accessed=bytes_accessed
        ),
    )(x, w_stack, b_stack)

    return out if b_pad == B else out[:B]


def init_params(key, input_size, output_size, hidden_layers):
    """Deterministic PyTorch-style (uniform +/- 1/sqrt(fan_in)) init."""
    sizes = [input_size] + list(hidden_layers) + [output_size]
    weights, biases = [], []
    for i in range(len(sizes) - 1):
        fan_in, fan_out = sizes[i], sizes[i + 1]
        key, kw, kb = jax.random.split(key, 3)
        bound = 1.0 / jnp.sqrt(jnp.float32(fan_in))
        # stored as [in, out] (transpose of nn.Linear's [out, in])
        weights.append(jax.random.uniform(kw, (fan_in, fan_out), jnp.float32, -bound, bound))
        biases.append(jax.random.uniform(kb, (fan_out,), jnp.float32, -bound, bound))
    return weights, biases


def reference_forward(x, weights, biases):
    h = x
    for i in range(len(weights) - 1):
        h = jnp.maximum(h @ weights[i] + biases[i], 0.0)
    return h @ weights[-1] + biases[-1]


if __name__ == "__main__":
    # Shapes consistent with the module: batch=8, input=32, hidden=[64, 32], output=8
    input_size, output_size = 32, 8
    hidden_layers = [64, 32]
    batch = 8

    key = jax.random.PRNGKey(0)
    key, kx = jax.random.split(key)
    x = jax.random.normal(kx, (batch, input_size), jnp.float32)
    weights, biases = init_params(key, input_size, output_size, hidden_layers)

    fwd = jax.jit(high_level_policy_forward, static_argnums=(3,))

    # f32 weights: exact path, tight tolerance.
    w32, b32 = prepare_params(weights, biases, param_dtype=jnp.float32)
    out = jax.block_until_ready(fwd(x, w32, b32, output_size))
    ref = reference_forward(x, weights, biases)
    assert out.shape == (batch, output_size)
    assert jnp.allclose(out, ref, atol=1e-5, rtol=1e-5)

    # bf16 weights (native MXU dtype on v6e/v7x), f32 accumulation: looser tolerance.
    w16, b16 = prepare_params(weights, biases, param_dtype=jnp.bfloat16)
    out16 = jax.block_until_ready(fwd(x, w16, b16, output_size))
    assert out16.shape == (batch, output_size)
    assert jnp.allclose(out16, ref, atol=5e-2, rtol=5e-2)

    # Multi-tile batch: 600 rows -> 2 tiles of 304 (only 8 dead rows), even grid.
    big_b = 600
    key, kbx = jax.random.split(key)
    xb = jax.random.normal(kbx, (big_b, input_size), jnp.float32)
    outb = jax.block_until_ready(fwd(xb, w32, b32, output_size))
    refb = reference_forward(xb, weights, biases)
    assert outb.shape == (big_b, output_size)
    assert jnp.allclose(outb, refb, atol=1e-4, rtol=1e-4)

    print("KERNEL_OK")
</pallas_src>

<mosaic_0001>
module attributes {stable_mosaic.version = 11 : i64} {
  func.func @_mlp_kernel(%arg0: i32, %arg1: memref<8x32xf32, #tpu.memory_space<vmem>>, %arg2: memref<3x128x128xf32, #tpu.memory_space<vmem>>, %arg3: memref<3x1x128xf32, #tpu.memory_space<vmem>>, %arg4: memref<8x8xf32, #tpu.memory_space<vmem>>) attributes {dimension_semantics = [#tpu.dimension_semantics<parallel>], iteration_bounds = array<i64: 1>, scalar_prefetch = 0 : i64, scratch_operands = 0 : i64, tpu.core_type = #tpu.core_type<tc>, window_params = [{transform_indices = @transform_0, window_bounds = array<i64: 8, 32>}, {pipeline_mode = #tpu.pipeline_mode<synchronous>, transform_indices = @transform_1, window_bounds = array<i64: 3, 128, 128>}, {pipeline_mode = #tpu.pipeline_mode<synchronous>, transform_indices = @transform_2, window_bounds = array<i64: 3, 1, 128>}, {transform_indices = @transform_3, window_bounds = array<i64: 8, 8>}]} {
    %c0 = arith.constant 0 : index
    %c0_0 = arith.constant 0 : index
    %0 = vector.load %arg1[%c0, %c0_0] : memref<8x32xf32, #tpu.memory_space<vmem>>, vector<8x32xf32>
    %c0_1 = arith.constant 0 : index
    %c0_2 = arith.constant 0 : index
    %c0_3 = arith.constant 0 : index
    %1 = vector.load %arg2[%c0_1, %c0_2, %c0_3] : memref<3x128x128xf32, #tpu.memory_space<vmem>>, vector<1x128x128xf32>
    %2 = vector.shape_cast %1 : vector<1x128x128xf32> to vector<128x128xf32>
    %3 = vector.extract_strided_slice %2 {offsets = [0, 0], sizes = [32, 128], strides = [1, 1]} : vector<128x128xf32> to vector<32x128xf32>
    %cst = arith.constant dense<0.000000e+00> : vector<8x128xf32>
    %4 = tpu.matmul %0, %3, %cst {dimension_numbers = #tpu.dot_dimension_numbers<[1], [0], [0], [1], [0, 0, 1, 1], [], []>} : vector<8x32xf32>, vector<32x128xf32>, vector<8x128xf32> -> vector<8x128xf32>
    %c0_4 = arith.constant 0 : index
    %c0_5 = arith.constant 0 : index
    %c0_6 = arith.constant 0 : index
    %5 = vector.load %arg3[%c0_4, %c0_5, %c0_6] : memref<3x1x128xf32, #tpu.memory_space<vmem>>, vector<1x1x128xf32>
    %6 = vector.shape_cast %5 : vector<1x1x128xf32> to vector<1x128xf32>
    %7 = vector.broadcast %6 : vector<1x128xf32> to vector<8x128xf32>
    %8 = arith.addf %4, %7 : vector<8x128xf32>
    %cst_7 = arith.constant 0.000000e+00 : f32
    %9 = vector.broadcast %cst_7 : f32 to vector<8x128xf32>
    %10 = arith.maximumf %8, %9 : vector<8x128xf32>
    %c1 = arith.constant 1 : index
    %c0_8 = arith.constant 0 : index
    %c0_9 = arith.constant 0 : index
    %11 = vector.load %arg2[%c1, %c0_8, %c0_9] : memref<3x128x128xf32, #tpu.memory_space<vmem>>, vector<1x128x128xf32>
    %12 = vector.shape_cast %11 : vector<1x128x128xf32> to vector<128x128xf32>
    %cst_10 = arith.constant dense<0.000000e+00> : vector<8x128xf32>
    %13 = tpu.matmul %10, %12, %cst_10 {dimension_numbers = #tpu.dot_dimension_numbers<[1], [0], [0], [1], [0, 0, 1, 1], [], []>} : vector<8x128xf32>, vector<128x128xf32>, vector<8x128xf32> -> vector<8x128xf32>
    %c1_11 = arith.constant 1 : index
    %c0_12 = arith.constant 0 : index
    %c0_13 = arith.constant 0 : index
    %14 = vector.load %arg3[%c1_11, %c0_12, %c0_13] : memref<3x1x128xf32, #tpu.memory_space<vmem>>, vector<1x1x128xf32>
    %15 = vector.shape_cast %14 : vector<1x1x128xf32> to vector<1x128xf32>
    %16 = vector.broadcast %15 : vector<1x128xf32> to vector<8x128xf32>
    %17 = arith.addf %13, %16 : vector<8x128xf32>
    %cst_14 = arith.constant 0.000000e+00 : f32
    %18 = vector.broadcast %cst_14 : f32 to vector<8x128xf32>
    %19 = arith.maximumf %17, %18 : vector<8x128xf32>
    %c2 = arith.constant 2 : index
    %c0_15 = arith.constant 0 : index
    %c0_16 = arith.constant 0 : index
    %20 = vector.load %arg2[%c2, %c0_15, %c0_16] : memref<3x128x128xf32, #tpu.memory_space<vmem>>, vector<1x128x128xf32>
    %21 = vector.shape_cast %20 : vector<1x128x128xf32> to vector<128x128xf32>
    %cst_17 = arith.constant dense<0.000000e+00> : vector<8x128xf32>
    %22 = tpu.matmul %19, %21, %cst_17 {dimension_numbers = #tpu.dot_dimension_numbers<[1], [0], [0], [1], [0, 0, 1, 1], [], []>} : vector<8x128xf32>, vector<128x128xf32>, vector<8x128xf32> -> vector<8x128xf32>
    %c2_18 = arith.constant 2 : index
    %c0_19 = arith.constant 0 : index
    %c0_20 = arith.constant 0 : index
    %23 = vector.load %arg3[%c2_18, %c0_19, %c0_20] : memref<3x1x128xf32, #tpu.memory_space<vmem>>, vector<1x1x128xf32>
    %24 = vector.shape_cast %23 : vector<1x1x128xf32> to vector<1x128xf32>
    %25 = vector.broadcast %24 : vector<1x128xf32> to vector<8x128xf32>
    %26 = arith.addf %22, %25 : vector<8x128xf32>
    %27 = vector.extract_strided_slice %26 {offsets = [0, 0], sizes = [8, 8], strides = [1, 1]} : vector<8x128xf32> to vector<8x8xf32>
    %c0_21 = arith.constant 0 : index
    %c0_22 = arith.constant 0 : index
    %28 = vector.load %arg4[%c0_21, %c0_22] : memref<8x8xf32, #tpu.memory_space<vmem>>, vector<8x8xf32>
    tpu.vector_store %arg4[%c0_21, %c0_22], %27 {strides = array<i32>} : memref<8x8xf32, #tpu.memory_space<vmem>>, vector<8x8xf32>,
    return
  }
  func.func @transform_0(%arg0: i32) -> (i32, i32) {
    %c0_i32 = arith.constant 0 : i32
    %c0_i32_0 = arith.constant 0 : i32
    return %arg0, %c0_i32 : i32, i32
  }
  func.func @transform_1(%arg0: i32) -> (i32, i32, i32) {
    %c0_i32 = arith.constant 0 : i32
    %c0_i32_0 = arith.constant 0 : i32
    %c0_i32_1 = arith.constant 0 : i32
    %c0_i32_2 = arith.constant 0 : i32
    return %c0_i32, %c0_i32_0, %c0_i32_1 : i32, i32, i32
  }
  func.func @transform_2(%arg0: i32) -> (i32, i32, i32) {
    %c0_i32 = arith.constant 0 : i32
    %c0_i32_0 = arith.constant 0 : i32
    %c0_i32_1 = arith.constant 0 : i32
    %c0_i32_2 = arith.constant 0 : i32
    return %c0_i32, %c0_i32_0, %c0_i32_1 : i32, i32, i32
  }
  func.func @transform_3(%arg0: i32) -> (i32, i32) {
    %c0_i32 = arith.constant 0 : i32
    %c0_i32_0 = arith.constant 0 : i32
    return %arg0, %c0_i32 : i32, i32
  }
}

</mosaic_0001>

<bundles_post_ra>
// kernel: high_level_policy_forward.1
= control target key start
LH: loop header
LB: loop body
LE: loop exit
PB: predicated region body
PF: predicated region fallthrough
CT: control target
= control target key end

     0   :  { %8 = vsyncpa [#allocation3], 0  ;;  %s698_s0 = inlined_call_operand.hbm [shape: f32[8,32], index: 0, kind: input, shape index: {}]   ;;  %s699_s1 = inlined_call_operand.hbm [shape: f32[3,128,128], index: 1, kind: input, shape index: {}]   ;;  %s700_s2 = inlined_call_operand.vmem [shape: f32[3,1,128], index: 2, kind: input, shape index: {}]   ;;  %s701_s3 = inlined_call_operand.hbm [shape: f32[8,8], index: 3, kind: output, shape index: {}]  }
   0x1   :  { %9 = vsyncpa [#allocation6], 0 }
   0x2   :  { %10 = vsyncpa [#allocation4], 0  ;;  %s597_s12 = smov [#allocation2]   ;;  %s598_s14 = smov [#allocation5]  }
   0x3   :  { %s17_s13 = sshll.u32 %s597_s12, 4  ;;  %s26_s15 = sshll.u32 %s598_s14, 4  ;;  %s18_s13 = int_to_ptr.vmem [resolvable:$true] %s17_s13  ;;  %s625_s15 = int_to_ptr.vmem [resolvable:$true] %s26_s15 }
   0x4   :  { %s525_s18 = scalar_lea.hbm %s698_s0, 128 }
   0x5   :  { %p526_p0 = scmp.ne.s32.totalorder %s698_s0, %s525_s18  ;;  %p529_p1 = scmp.lt.u32.totalorder %s525_s18, %s698_s0 }
   0x7   :  { %p531_p2 = pnand %p529_p1, %p526_p0 }
   0x9   :  { %534 = shalt.err (!%p531_p2)
}
   0xa   :  { %s535_s23 = scalar_lea.vmem %s18_s13, 128  ;;  %p540_p4 = scmp.lt.s32.totalorder %s18_s13, %s18_s13 }
   0xb   :  { %p536_p3 = scmp.ne.s32.totalorder %s18_s13, %s535_s23  ;;  %p541_p5 = scmp.lt.s32.totalorder %s535_s23, %s535_s23 }
   0xd   :  { %p542_p6 = por %p541_p5, %p540_p4 }
   0xf   :  { %p543_p7 = pnand %p542_p6, %p536_p3 }
  0x11   :  { %546 = shalt.err (!%p543_p7)
}
  0x12   :  { %20 = dma.hbm_to_vmem [thread:$0]  %s698_s0, 128, %s18_s13, [#allocation3]  }
  0x13   :  { %s547_s28 = scalar_lea.hbm %s699_s1, 6144 }
  0x14   :  { %p548_p8 = scmp.ne.s32.totalorder %s699_s1, %s547_s28  ;;  %p551_p9 = scmp.lt.u32.totalorder %s547_s28, %s699_s1 }
  0x16   :  { %p553_p10 = pnand %p551_p9, %p548_p8 }
  0x18   :  { %556 = shalt.err (!%p553_p10)
}
  0x19   :  { %s557_s6 = scalar_lea.vmem %s625_s15, 6144  ;;  %p562_p12 = scmp.lt.s32.totalorder %s625_s15, %s625_s15 }
  0x1a   :  { %p558_p11 = scmp.ne.s32.totalorder %s625_s15, %s557_s6  ;;  %p563_p13 = scmp.lt.s32.totalorder %s557_s6, %s557_s6 }
  0x1c   :  { %p564_p0 = por %p563_p13, %p562_p12 }
  0x1e   :  { %p565_p1 = pnand %p564_p0, %p558_p11 }
  0x20   :  { %568 = shalt.err (!%p565_p1)
}
  0x21   :  { %s599_s0 = smov 128   ;;  %s600_s7 = smov 8  }
  0x22   :  { %32 = dma.hbm_to_vmem [thread:$0]  %s699_s1, 6144, %s625_s15, [#allocation6], %s599_s0, %s599_s0, %s600_s7  }
  0x23   :  { %591 = dma.done.wait [#allocation3], 128  }
  0x24   :  { %592 = vsyncadd [#allocation3], 4294967168 }
  0x25   :  { %593 = dma.done.wait [#allocation6], 6144  }
  0x26   :  { %594 = vsyncadd [#allocation6], 4294961152  ;;  %v601_v0 = vmov 0.0|0.0   ;;  %vm602_vm0 = vmmov 0   ;;  %v603_v1 = vmov 0.0   ;;  %v42_v2 = vld [vmem:[#allocation5] sm:$0xff] }
  0x27   :  { %463 = vmatprep.subr.bf16.mxu0 %v601_v0  ;;  %390 = vmatprep.mubr.msk.f32.mxu0 %vm602_vm0, %v603_v1  ;;  %v43_v3 = vld [vmem:[#allocation5 + $0x8] sm:$0xff]  ;;  %v44_v4 = vld [vmem:[#allocation5 + $0x10] sm:$0xff]  ;;  %v45_v6 = vld [vmem:[#allocation5 + $0x18] sm:$0xff]  ;;  %vm53_vm1 = vcmask 261120   ;;  %s604_s15 = smov [#allocation7]   ;;  %vm319_vm2 = vcmask 64512  }
  0x28   :  { %469 = vmatprep.subr.bf16.mxu1 %v601_v0  ;;  %425 = vmatprep.mubr.msk.f32.mxu1 %vm602_vm0, %v603_v1  ;;  %v464_v5 = vpack.c.bf16 %v43_v3, %v42_v2  ;;  %v129_v7 = vld [vmem:[#allocation5 + $0x80] sm:$0xff]  ;;  %v130_v8 = vld [vmem:[#allocation5 + $0x88] sm:$0xff]  ;;  %v131_v9 = vld [vmem:[#allocation5 + $0x90] sm:$0xff]  ;;  %v467_v11 = vpack.c.bf16 %v45_v6, %v44_v4  ;;  %s327_s16 = sshll.u32 %s604_s15, 4  ;;  %s328_s16 = int_to_ptr.vmem [resolvable:$true] %s327_s16 }
  0x29   :  { %v132_v10 = vld [vmem:[#allocation5 + $0x98] sm:$0xff]  ;;  %v470_v12 = vpack.c.bf16 %v130_v8, %v129_v7  ;;  %v133_v14 = vld [vmem:[#allocation5 + $0xa0] sm:$0xff]  ;;  %v134_v15 = vld [vmem:[#allocation5 + $0xa8] sm:$0xff]  ;;  %s569_s17 = scalar_lea.vmem %s328_s16, 128  ;;  %p574_p3 = scmp.lt.s32.totalorder %s328_s16, %s328_s16 }
  0x2a   :  { %465 = vmatpush3.bf16.msra.mxu0 %v464_v5  ;;  %v473_v13 = vpack.c.bf16 %v132_v10, %v131_v9  ;;  %v41_v16 = vld [vmem:[#allocation2] sm:$0xff]  ;;  %v476_v17 = vpack.c.bf16 %v134_v15, %v133_v14  ;;  %v135_v18 = vld [vmem:[#allocation5 + $0xb0] sm:$0xff]  ;;  %v137_v21 = vld [vmem:[#allocation5 + $0xc0] sm:$0xff]  ;;  %p570_p2 = scmp.ne.s32.totalorder %s328_s16, %s569_s17  ;;  %p575_p4 = scmp.lt.s32.totalorder %s569_s17, %s569_s17 }
  0x2b   :  { %466 = vmatprep.subr.bf16.mxu0 %v601_v0  ;;  %471 = vmatpush3.bf16.msra.mxu1 %v470_v12  ;;  %v136_v19 = vld [vmem:[#allocation5 + $0xb8] sm:$0xff]  ;;  %v138_v22 = vld [vmem:[#allocation5 + $0xc8] sm:$0xff]  ;;  %v139_v24 = vld [vmem:[#allocation5 + $0xd0] sm:$0xff] }
  0x2c   :  { %472 = vmatprep.subr.bf16.mxu1 %v601_v0  ;;  %v479_v20 = vpack.c.bf16 %v136_v19, %v135_v18  ;;  %v482_v23 = vpack.c.bf16 %v138_v22, %v137_v21  ;;  %v140_v25 = vld [vmem:[#allocation5 + $0xd8] sm:$0xff]  ;;  %v141_v27 = vld [vmem:[#allocation5 + $0xe0] sm:$0xff]  ;;  %v142_v28 = vld [vmem:[#allocation5 + $0xe8] sm:$0xff]  ;;  %p576_p5 = por %p575_p4, %p574_p3 }
  0x2d   :  { %v485_v26 = vpack.c.bf16 %v140_v25, %v139_v24  ;;  %v488_v29 = vpack.c.bf16 %v142_v28, %v141_v27  ;;  %v143_v30 = vld [vmem:[#allocation5 + $0xf0] sm:$0xff]  ;;  %v144_v31 = vld [vmem:[#allocation5 + $0xf8] sm:$0xff]  ;;  %v225_v33 = vld [vmem:[#allocation5 + $0x100] sm:$0xff] }
  0x2e   :  { %468 = vmatpush3.bf16.msra.mxu0 %v467_v11  ;;  %v491_v32 = vpack.c.bf16 %v144_v31, %v143_v30  ;;  %v226_v34 = vld [vmem:[#allocation5 + $0x108] sm:$0xff]  ;;  %v227_v35 = vld [vmem:[#allocation5 + $0x110] sm:$0xff]  ;;  %v228_v37 = vld [vmem:[#allocation5 + $0x118] sm:$0xff]  ;;  %p577_p6 = pnand %p576_p5, %p570_p2 }
  0x2f   :  { %493 = vmatprep.subr.bf16.mxu0 %v601_v0  ;;  %474 = vmatpush3.bf16.msra.mxu1 %v473_v13  ;;  %v494_v36 = vpack.c.bf16 %v226_v34, %v225_v33  ;;  %v497_v38 = vpack.c.bf16 %v228_v37, %v227_v35  ;;  %v229_v39 = vld [vmem:[#allocation5 + $0x120] sm:$0xff]  ;;  %v230_v40 = vld [vmem:[#allocation5 + $0x128] sm:$0xff]  ;;  %v231_v42 = vld [vmem:[#allocation5 + $0x130] sm:$0xff] }
  0x30   :  { %475 = vmatprep.subr.bf16.mxu1 %v601_v0  ;;  %v500_v41 = vpack.c.bf16 %v230_v40, %v229_v39  ;;  %v232_v43 = vld [vmem:[#allocation5 + $0x138] sm:$0xff]  ;;  %v233_v45 = vld [vmem:[#allocation5 + $0x140] sm:$0xff]  ;;  %v234_v46 = vld [vmem:[#allocation5 + $0x148] sm:$0xff] }
  0x31   :  { %391 = vmatmul.mubr.msk.f32.vlgmr.msra.gmra.mrb[0].mxu0 %vm53_vm1, %v41_v16  ;;  %v503_v44 = vpack.c.bf16 %v232_v43, %v231_v42  ;;  %v506_v47 = vpack.c.bf16 %v234_v46, %v233_v45  ;;  %v235_v48 = vld [vmem:[#allocation5 + $0x150] sm:$0xff]  ;;  %v236_v49 = vld [vmem:[#allocation5 + $0x158] sm:$0xff]  ;;  %v237_v51 = vld [vmem:[#allocation5 + $0x160] sm:$0xff] }
  0x32   :  { %460 = vmatprep.mubr.msk.f32.mxu0 %vm602_vm0, %v603_v1  ;;  %495 = vmatpush3.bf16.msra.mxu0 %v494_v36  ;;  %v509_v50 = vpack.c.bf16 %v236_v49, %v235_v48  ;;  %v238_v52 = vld [vmem:[#allocation5 + $0x168] sm:$0xff]  ;;  %v337_v54 = vld [vmem:[%s700_s2] ss:$0 sm:$0xff]  ;;  %v239_v59 = vld [vmem:[#allocation5 + $0x170] sm:$0xff] }
  0x33   :  { %477 = vmatpush3.bf16.msra.mxu1 %v476_v17  ;;  %496 = vmatprep.subr.bf16.mxu0 %v601_v0  ;;  %v512_v53 = vpack.c.bf16 %v238_v52, %v237_v51  ;;  %v240_v60 = vld [vmem:[#allocation5 + $0x178] sm:$0xff] }
  0x34   :  { %478 = vmatprep.subr.bf16.mxu1 %v601_v0  ;;  %v515_v61 = vpack.c.bf16 %v240_v60, %v239_v59  ;;  %v340_v62 = vld [vmem:[%s700_s2 + $0x1] ss:$0 sm:$0xff]  ;;  %v342_v3 = vld [vmem:[%s700_s2 + $0x2] ss:$0 sm:$0xff] }
  0x36   :  { %498 = vmatpush3.bf16.msra.mxu0 %v497_v38 }
  0x37   :  { %480 = vmatpush3.bf16.msra.mxu1 %v479_v20  ;;  %499 = vmatprep.subr.bf16.mxu0 %v601_v0 }
  0x38   :  { %481 = vmatprep.subr.bf16.mxu1 %v601_v0 }
  0x3a   :  { %501 = vmatpush3.bf16.msra.mxu0 %v500_v41 }
  0x3b   :  { %483 = vmatpush3.bf16.msra.mxu1 %v482_v23  ;;  %502 = vmatprep.subr.bf16.mxu0 %v601_v0 }
  0x3c   :  { %484 = vmatprep.subr.bf16.mxu1 %v601_v0 }
  0x3e   :  { %504 = vmatpush3.bf16.msra.mxu0 %v503_v44 }
  0x3f   :  { %486 = vmatpush3.bf16.msra.mxu1 %v485_v26  ;;  %505 = vmatprep.subr.bf16.mxu0 %v601_v0 }
  0x40   :  { %487 = vmatprep.subr.bf16.mxu1 %v601_v0 }
  0x42   :  { %507 = vmatpush3.bf16.msra.mxu0 %v506_v47 }
  0x43   :  { %489 = vmatpush3.bf16.msra.mxu1 %v488_v29  ;;  %508 = vmatprep.subr.bf16.mxu0 %v601_v0 }
  0x44   :  { %490 = vmatprep.subr.bf16.mxu1 %v601_v0 }
  0x46   :  { %510 = vmatpush3.bf16.msra.mxu0 %v509_v50 }
  0x47   :  { %492 = vmatpush3.bf16.msra.mxu1 %v491_v32  ;;  %511 = vmatprep.subr.bf16.mxu0 %v601_v0 }
  0x4a   :  { %513 = vmatpush3.bf16.msra.mxu0 %v512_v53 }
  0x4b   :  { %514 = vmatprep.subr.bf16.mxu0 %v601_v0 }
  0x4e   :  { %516 = vmatpush3.bf16.msra.mxu0 %v515_v61 }
 0x104   :  { %v123_v55 = vpop.f32.mrb[0].mxu0 }
 0x105   :  { %v124_v56 = vadd.f32 %v337_v54, %v123_v55  ;;  %v392_v57 = vpop.f32.mrb[1].mxu0 }
 0x107   :  { %v127_v58 = vmax.f32 %v124_v56, 0.0 }
 0x109   :  { %426 = vmatmul.mubr.f32.vlgmr.msra.gmra.mrb[0].mxu1 %v127_v58 }
 0x1dc   :  { %v219_v63 = vpop.f32.mrb[0].mxu1 }
 0x1dd   :  { %v220_v1 = vadd.f32 %v340_v62, %v219_v63  ;;  %v427_v0 = vpop.f32.mrb[1].mxu1 }
 0x1df   :  { %v223_v2 = vmax.f32 %v220_v1, 0.0 }
 0x1e1   :  { %461 = vmatmul.mubr.f32.vlgmr.msra.gmra.mrb[2].mxu0 %v223_v2 }
 0x2b4   :  { %v315_v4 = vpop.f32.mrb[2].mxu0 }
 0x2b5   :  { %v316_v5 = vadd.f32 %v342_v3, %v315_v4  ;;  %v462_v6 = vpop.f32.mrb[3].mxu0 }
 0x2b7   :  { %320 = vst.msk [vmem:[#allocation7] sm:$0xff] %vm319_vm2, %v316_v5 }
 0x2b8   :  { %580 = shalt.err (!%p577_p6)
}
 0x2b9   :  { %s581_s20 = scalar_lea.hbm %s701_s3, 128 }
 0x2ba   :  { %p582_p7 = scmp.ne.s32.totalorder %s701_s3, %s581_s20  ;;  %p585_p8 = scmp.lt.u32.totalorder %s581_s20, %s701_s3 }
 0x2bc   :  { %p587_p9 = pnand %p585_p8, %p582_p7 }
 0x2be   :  { %590 = shalt.err (!%p587_p9)
}
 0x2bf   :  { %330 = dma.vmem_to_hbm [thread:$0]  %s328_s16, 128, %s701_s3, [#allocation4]  }
 0x2c0   :  { %595 = dma.done.wait [#allocation4], 128  }
 0x2c1   :  { %596 = vsyncadd [#allocation4], 4294967168 }
 0x2c2   :  { %334 = vsyncpa [#allocation3], 1 }
 0x2c3   :  { %335 = vsyncpa [#allocation6], 1 }
 0x2c4   :  { %336 = vsyncpa [#allocation4], 1 }

</bundles_post_ra>
